<compile_context>
chip_gen: v7x
topology: tpu7x:2x2x1
jax: 0.10.0
libtpu: 0.0.40
codegen_flags: <defaults>
</compile_context>

<pallas_src>
import functools

import jax
import jax.numpy as jnp
from jax.experimental import pallas as pl
from jax.experimental.pallas import tpu as pltpu

NUM_CLASSES = 8
J = 4
CLS_AGNOSTIC_BBOX_REG = False
DIM_IN = 32
PRED_PER_JOINT = 5 * J
POSE_DIM = PRED_PER_JOINT * (2 if CLS_AGNOSTIC_BBOX_REG else NUM_CLASSES)  # 160

TILE_N_MAX = 2048   # rows per grid step (see footprint accounting above)


def _round_up(x, m):
    return ((x + m - 1) // m) * m


def _lcrnet_kernel(x_ref, wc_ref, bc_ref, wp_ref, bp_ref, cls_ref, pose_ref,
                   *, apply_softmax):
    """One row-tile: cls head (+ softmax) and pose head, two dense outputs."""
    x = x_ref[...]

    # cls head: (tile_n, D) @ (D, 8) -> logits live in one 128-lane tile, so
    # the softmax reductions / exp only touch a single lane-tile (XLU/EUP
    # friendly on v7x once the memory side is no longer binding).
    logits = jnp.dot(x, wc_ref[...], preferred_element_type=jnp.float32)
    logits = logits + bc_ref[...]
    if apply_softmax:   # inference path (not self.training)
        m = jnp.max(logits, axis=-1, keepdims=True)
        e = jnp.exp(logits - m)
        denom = jnp.sum(e, axis=-1, keepdims=True)
        cls = e / denom                     # exact divide: rows sum to 1
    else:
        cls = logits
    cls_ref[...] = cls.astype(cls_ref.dtype)

    # pose head: the 1/5 scale is folded into wp/bp once at prep time
    # (prepare_params), so no per-element multiply here.
    pose = jnp.dot(x, wp_ref[...], preferred_element_type=jnp.float32)
    pose_ref[...] = (pose + bp_ref[...]).astype(pose_ref.dtype)


def prepare_params(wp, bp):
    """One-time constant fold of the /5.0 pose scale into the parameters."""
    return wp / 5.0, bp / 5.0


def lcrnet_outputs_forward(x, wc, bc, wp5, bp5, *, training=False,
                           out_dtype=jnp.float32):
    """x: (N, dim_in) or (N, dim_in, 1, 1) float32.
    wc: (D, NUM_CLASSES), bc: (1, NUM_CLASSES),
    wp5/bp5: pose params with the /5 already folded in (prepare_params).
    Returns (cls_score (N, NUM_CLASSES), pose_pred (N, POSE_DIM))."""
    if x.ndim == 4:
        # mirrors x.squeeze(3).squeeze(2) on an (N, C, 1, 1) tensor
        x = x.reshape(x.shape[0], x.shape[1])
    n, d = x.shape
    num_classes = wc.shape[1]
    pose_dim = wp5.shape[1]

    # Pad rows only to the 8-row sublane multiple (<= 7 rows), not to a full
    # tile multiple: the ragged final grid block is handled by Pallas.
    n_pad = _round_up(max(n, 8), 8)
    if n_pad != n:
        x = jnp.pad(x, ((0, n_pad - n), (0, 0)))

    # At least 2 grid steps when there are enough rows so v7x's two
    # TensorCores both get work and the pipeline has an i±1 step to overlap;
    # floor of 128 rows so tiles aren't too tiny to amortize step overhead.
    tile_n = min(TILE_N_MAX, n_pad, max(128, _round_up(pl.cdiv(n_pad, 2), 8)))
    grid = (pl.cdiv(n_pad, tile_n),)

    cls, pose = pl.pallas_call(
        functools.partial(_lcrnet_kernel, apply_softmax=not training),
        out_shape=(
            jax.ShapeDtypeStruct((n_pad, num_classes), out_dtype),
            jax.ShapeDtypeStruct((n_pad, pose_dim), out_dtype),
        ),
        grid=grid,
        in_specs=[
            pl.BlockSpec((tile_n, d), lambda i: (i, 0)),          # x: row-tiled
            pl.BlockSpec((d, num_classes), lambda i: (0, 0)),     # Wc resident
            pl.BlockSpec((1, num_classes), lambda i: (0, 0)),     # bc resident
            pl.BlockSpec((d, pose_dim), lambda i: (0, 0)),        # Wp resident
            pl.BlockSpec((1, pose_dim), lambda i: (0, 0)),        # bp resident
        ],
        out_specs=(
            pl.BlockSpec((tile_n, num_classes), lambda i: (i, 0)),
            pl.BlockSpec((tile_n, pose_dim), lambda i: (i, 0)),
        ),
        compiler_params=pltpu.CompilerParams(
            dimension_semantics=("parallel",),   # shard row tiles across TCs (v7x)
            vmem_limit_bytes=32 * 1024 * 1024,
        ),
    )(x, wc, bc, wp5, bp5)

    if n_pad != n:
        cls = cls[:n]
        pose = pose[:n]
    return cls, pose


def init_params(key, dim_in):
    """Re-implementation of _init_weights():
    cls_score.weight ~ N(0, 0.01), bias = 0
    pose_pred.weight ~ N(0, 0.001), bias = 0
    Weights stored already transposed to (dim_in, out)."""
    k1, k2 = jax.random.split(key)
    wc = 0.01 * jax.random.normal(k1, (dim_in, NUM_CLASSES), dtype=jnp.float32)
    bc = jnp.zeros((1, NUM_CLASSES), dtype=jnp.float32)
    wp = 0.001 * jax.random.normal(k2, (dim_in, POSE_DIM), dtype=jnp.float32)
    bp = jnp.zeros((1, POSE_DIM), dtype=jnp.float32)
    return wc, bc, wp, bp


def reference_forward(x, wc, bc, wp, bp):
    if x.ndim == 4:
        x = x.reshape(x.shape[0], x.shape[1])
    logits = x @ wc + bc
    cls = jax.nn.softmax(logits, axis=1)
    pose = (x @ wp + bp) / 5.0
    return cls, pose


def _check(x, wc, bc, wp, bp, wp5, bp5):
    cls_score, pose_pred = lcrnet_outputs_forward(x, wc, bc, wp5, bp5)
    jax.block_until_ready((cls_score, pose_pred))
    cls_ref, pose_ref = reference_forward(x, wc, bc, wp, bp)
    n = x.shape[0]
    assert cls_score.shape == (n, NUM_CLASSES)
    assert pose_pred.shape == (n, POSE_DIM)
    assert jnp.allclose(pose_pred, pose_ref, atol=1e-4, rtol=1e-3)
    assert jnp.allclose(cls_score, cls_ref, atol=1e-4, rtol=1e-3)
    # Exact-divide softmax: rows sum to 1 up to float rounding.
    assert jnp.allclose(jnp.sum(cls_score, axis=1), 1.0, atol=1e-4)


if __name__ == "__main__":
    key = jax.random.PRNGKey(0)
    kx, kx2, kp = jax.random.split(key, 3)

    wc, bc, wp, bp = init_params(kp, DIM_IN)
    wp5, bp5 = prepare_params(wp, bp)   # one-time /5 constant fold

    # NCHW input with H = W = 1, as produced by the RoI head avg-pool.
    # N = 13: not a multiple of 8 -> exercises the sublane pad + row slice.
    x_small = jax.random.normal(kx, (13, DIM_IN, 1, 1), dtype=jnp.float32)
    _check(x_small, wc, bc, wp, bp, wp5, bp5)

    # N = 325: multi-step grid with a ragged final block (n_pad=328, tile=168).
    x_big = jax.random.normal(kx2, (325, DIM_IN, 1, 1), dtype=jnp.float32)
    _check(x_big, wc, bc, wp, bp, wp5, bp5)

    print("KERNEL_OK")
</pallas_src>

<mosaic_0001>
module attributes {stable_mosaic.version = 11 : i64} {
  func.func @_lcrnet_kernel(%arg0: i32, %arg1: memref<16x32xf32, #tpu.memory_space<vmem>>, %arg2: memref<32x8xf32, #tpu.memory_space<vmem>>, %arg3: memref<1x8xf32, #tpu.memory_space<vmem>>, %arg4: memref<32x160xf32, #tpu.memory_space<vmem>>, %arg5: memref<1x160xf32, #tpu.memory_space<vmem>>, %arg6: memref<16x8xf32, #tpu.memory_space<vmem>>, %arg7: memref<16x160xf32, #tpu.memory_space<vmem>>) attributes {dimension_semantics = [#tpu.dimension_semantics<parallel>], iteration_bounds = array<i64: 1>, scalar_prefetch = 0 : i64, scratch_operands = 0 : i64, tpu.core_type = #tpu.core_type<tc>, window_params = [{transform_indices = @transform_0, window_bounds = array<i64: 16, 32>}, {pipeline_mode = #tpu.pipeline_mode<synchronous>, transform_indices = @transform_1, window_bounds = array<i64: 32, 8>}, {pipeline_mode = #tpu.pipeline_mode<synchronous>, transform_indices = @transform_2, window_bounds = array<i64: 1, 8>}, {pipeline_mode = #tpu.pipeline_mode<synchronous>, transform_indices = @transform_3, window_bounds = array<i64: 32, 160>}, {pipeline_mode = #tpu.pipeline_mode<synchronous>, transform_indices = @transform_4, window_bounds = array<i64: 1, 160>}, {transform_indices = @transform_5, window_bounds = array<i64: 16, 8>}, {transform_indices = @transform_6, window_bounds = array<i64: 16, 160>}]} {
    %c0 = arith.constant 0 : index
    %c0_0 = arith.constant 0 : index
    %0 = vector.load %arg1[%c0, %c0_0] : memref<16x32xf32, #tpu.memory_space<vmem>>, vector<16x32xf32>
    %c0_1 = arith.constant 0 : index
    %c0_2 = arith.constant 0 : index
    %1 = vector.load %arg2[%c0_1, %c0_2] : memref<32x8xf32, #tpu.memory_space<vmem>>, vector<32x8xf32>
    %cst = arith.constant dense<0.000000e+00> : vector<16x8xf32>
    %2 = tpu.matmul %0, %1, %cst {dimension_numbers = #tpu.dot_dimension_numbers<[1], [0], [0], [1], [0, 0, 1, 1], [], []>} : vector<16x32xf32>, vector<32x8xf32>, vector<16x8xf32> -> vector<16x8xf32>
    %c0_3 = arith.constant 0 : index
    %c0_4 = arith.constant 0 : index
    %3 = vector.load %arg3[%c0_3, %c0_4] : memref<1x8xf32, #tpu.memory_space<vmem>>, vector<1x8xf32>
    %4 = vector.broadcast %3 : vector<1x8xf32> to vector<16x8xf32>
    %5 = arith.addf %2, %4 : vector<16x8xf32>
    %cst_5 = arith.constant dense<0xFF800000> : vector<16xf32>
    %6 = vector.multi_reduction <maximumf>, %5, %cst_5 [1] : vector<16x8xf32> to vector<16xf32>
    %7 = vector.shape_cast %6 : vector<16xf32> to vector<16x1xf32>
    %8 = vector.broadcast %7 : vector<16x1xf32> to vector<16x8xf32>
    %9 = arith.subf %5, %8 : vector<16x8xf32>
    %10 = math.exp %9 : vector<16x8xf32>
    %cst_6 = arith.constant dense<0.000000e+00> : vector<16xf32>
    %11 = vector.multi_reduction <add>, %10, %cst_6 [1] : vector<16x8xf32> to vector<16xf32>
    %12 = vector.shape_cast %11 : vector<16xf32> to vector<16x1xf32>
    %13 = vector.broadcast %12 : vector<16x1xf32> to vector<16x8xf32>
    %14 = arith.divf %10, %13 : vector<16x8xf32>
    %c0_7 = arith.constant 0 : index
    %c0_8 = arith.constant 0 : index
    %15 = vector.load %arg6[%c0_7, %c0_8] : memref<16x8xf32, #tpu.memory_space<vmem>>, vector<16x8xf32>
    tpu.vector_store %arg6[%c0_7, %c0_8], %14 {strides = array<i32>} : memref<16x8xf32, #tpu.memory_space<vmem>>, vector<16x8xf32>,
    %c0_9 = arith.constant 0 : index
    %c0_10 = arith.constant 0 : index
    %16 = vector.load %arg4[%c0_9, %c0_10] : memref<32x160xf32, #tpu.memory_space<vmem>>, vector<32x160xf32>
    %cst_11 = arith.constant dense<0.000000e+00> : vector<16x160xf32>
    %17 = tpu.matmul %0, %16, %cst_11 {dimension_numbers = #tpu.dot_dimension_numbers<[1], [0], [0], [1], [0, 0, 1, 1], [], []>} : vector<16x32xf32>, vector<32x160xf32>, vector<16x160xf32> -> vector<16x160xf32>
    %c0_12 = arith.constant 0 : index
    %c0_13 = arith.constant 0 : index
    %18 = vector.load %arg5[%c0_12, %c0_13] : memref<1x160xf32, #tpu.memory_space<vmem>>, vector<1x160xf32>
    %19 = vector.broadcast %18 : vector<1x160xf32> to vector<16x160xf32>
    %20 = arith.addf %17, %19 : vector<16x160xf32>
    %c0_14 = arith.constant 0 : index
    %c0_15 = arith.constant 0 : index
    %21 = vector.load %arg7[%c0_14, %c0_15] : memref<16x160xf32, #tpu.memory_space<vmem>>, vector<16x160xf32>
    tpu.vector_store %arg7[%c0_14, %c0_15], %20 {strides = array<i32>} : memref<16x160xf32, #tpu.memory_space<vmem>>, vector<16x160xf32>,
    return
  }
  func.func @transform_0(%arg0: i32) -> (i32, i32) {
    %c0_i32 = arith.constant 0 : i32
    %c0_i32_0 = arith.constant 0 : i32
    return %arg0, %c0_i32 : i32, i32
  }
  func.func @transform_1(%arg0: i32) -> (i32, i32) {
    %c0_i32 = arith.constant 0 : i32
    %c0_i32_0 = arith.constant 0 : i32
    %c0_i32_1 = arith.constant 0 : i32
    return %c0_i32, %c0_i32_0 : i32, i32
  }
  func.func @transform_2(%arg0: i32) -> (i32, i32) {
    %c0_i32 = arith.constant 0 : i32
    %c0_i32_0 = arith.constant 0 : i32
    %c0_i32_1 = arith.constant 0 : i32
    return %c0_i32, %c0_i32_0 : i32, i32
  }
  func.func @transform_3(%arg0: i32) -> (i32, i32) {
    %c0_i32 = arith.constant 0 : i32
    %c0_i32_0 = arith.constant 0 : i32
    %c0_i32_1 = arith.constant 0 : i32
    return %c0_i32, %c0_i32_0 : i32, i32
  }
  func.func @transform_4(%arg0: i32) -> (i32, i32) {
    %c0_i32 = arith.constant 0 : i32
    %c0_i32_0 = arith.constant 0 : i32
    %c0_i32_1 = arith.constant 0 : i32
    return %c0_i32, %c0_i32_0 : i32, i32
  }
  func.func @transform_5(%arg0: i32) -> (i32, i32) {
    %c0_i32 = arith.constant 0 : i32
    %c0_i32_0 = arith.constant 0 : i32
    return %arg0, %c0_i32 : i32, i32
  }
  func.func @transform_6(%arg0: i32) -> (i32, i32) {
    %c0_i32 = arith.constant 0 : i32
    %c0_i32_0 = arith.constant 0 : i32
    return %arg0, %c0_i32 : i32, i32
  }
}

</mosaic_0001>

<bundles_post_ra>
// kernel: tpu_custom_call.1
= control target key start
LH: loop header
LB: loop body
LE: loop exit
PB: predicated region body
PF: predicated region fallthrough
CT: control target
= control target key end

     0   :  { %12 = vsyncpa [#allocation3], 0  ;;  %s490_s0 = inlined_call_operand.vmem [shape: f32[16,32], index: 0, kind: input, shape index: {}]   ;;  %s491_s1 = inlined_call_operand.vmem [shape: f32[32,8], index: 1, kind: input, shape index: {}]   ;;  %s492_s2 = inlined_call_operand.vmem [shape: f32[1,8], index: 2, kind: input, shape index: {}]   ;;  %s493_s3 = inlined_call_operand.hbm [shape: f32[32,160], index: 3, kind: input, shape index: {}]   ;;  %s494_s4 = inlined_call_operand.vmem [shape: f32[1,160], index: 4, kind: input, shape index: {}]   ;;  %s495_s5 = inlined_call_operand.vmem [shape: f32[16,8], index: 5, kind: output, shape index: {0}]   ;;  %s496_s6 = inlined_call_operand.hbm [shape: f32[16,160], index: 6, kind: output, shape index: {1}]  }
   0x1   :  { %13 = vsyncpa [#allocation4], 0  ;;  %s378_s21 = smov [#allocation2]   ;;  %s330_s25 = scalar_lea.hbm %s493_s3, 1024 }
   0x2   :  { %s25_s22 = sshll.u32 %s378_s21, 4  ;;  %p331_p0 = scmp.ne.s32.totalorder %s493_s3, %s330_s25  ;;  %s26_s22 = int_to_ptr.vmem [resolvable:$true] %s25_s22 }
   0x3   :  { %p334_p1 = scmp.lt.u32.totalorder %s330_s25, %s493_s3 }
   0x5   :  { %p336_p2 = pnand %p334_p1, %p331_p0 }
   0x7   :  { %339 = shalt.err (!%p336_p2)
}
   0x8   :  { %s340_s30 = scalar_lea.vmem %s26_s22, 1024  ;;  %p345_p4 = scmp.lt.s32.totalorder %s26_s22, %s26_s22 }
   0x9   :  { %p341_p3 = scmp.ne.s32.totalorder %s26_s22, %s340_s30  ;;  %p346_p5 = scmp.lt.s32.totalorder %s340_s30, %s340_s30 }
   0xb   :  { %p347_p6 = por %p346_p5, %p345_p4 }
   0xd   :  { %p348_p7 = pnand %p347_p6, %p341_p3 }
   0xf   :  { %351 = shalt.err (!%p348_p7)
}
  0x10   :  { %s379_s7 = smov 256   ;;  %s380_s8 = smov 16  }
  0x11   :  { %31 = dma.hbm_to_vmem [thread:$0]  %s493_s3, 1024, %s26_s22, [#allocation3], %s379_s7, %s379_s7, %s380_s8  }
  0x12   :  { %374 = dma.done.wait [#allocation3], 1024  }
  0x13   :  { %375 = vsyncadd [#allocation3], 4294966272  ;;  %vm50_vm0 = vcmask 261120   ;;  %v39_v0 = vld [vmem:[%s491_s1] sm:$0xff]  ;;  %v40_v1 = vld [vmem:[%s491_s1 + $0x8] sm:$0xff]  ;;  %v381_v15 = vmov 0.0   ;;  %v167_v38 = vlaneseq }
  0x14   :  { %v41_v2 = vld [vmem:[%s491_s1 + $0x10] sm:$0xff]  ;;  %v301_v3 = vpack.c.bf16 %v40_v1, %v39_v0  ;;  %v42_v4 = vld [vmem:[%s491_s1 + $0x18] sm:$0xff]  ;;  %v37_v5 = vld [vmem:[%s490_s0] sm:$0xff]  ;;  %241 = vmatprep.mubr.f32.mxu1 %v381_v15  ;;  %vm132_vm1 = vcmask 64512   ;;  %s382_s23 = smov [#allocation5]  }
  0x15   :  { %v305_v6 = vpack.c.bf16 %v42_v4, %v41_v2  ;;  %298 = vmatprep.mubr.msk.f32.mxu0 %vm50_vm0, %v37_v5  ;;  %v38_v7 = vld [vmem:[%s490_s0 + $0x8] sm:$0xff]  ;;  %v160_v9 = vld [vmem:[#allocation2 + $0x18] sm:$0xff]  ;;  %v157_v10 = vld [vmem:[#allocation2] sm:$0xff]  ;;  %v168_v39 = vshrl.u32 %v167_v38, 7  ;;  %s265_s24 = sshll.u32 %s382_s23, 4  ;;  %s266_s24 = int_to_ptr.vmem [resolvable:$true] %s265_s24 }
  0x16   :  { %302 = vmatprep.subr.bf16.mxu0 %v301_v3  ;;  %v158_v8 = vld [vmem:[#allocation2 + $0x8] sm:$0xff]  ;;  %v159_v12 = vld [vmem:[#allocation2 + $0x10] sm:$0xff]  ;;  %v164_v14 = vld [vmem:[#allocation2 + $0x38] sm:$0xff]  ;;  %p357_p9 = scmp.lt.s32.totalorder %s266_s24, %s266_s24 }
  0x17   :  { %304 = vmatpush3.bf16.msra.mxu0 %v301_v3  ;;  %v309_v11 = vpack.c.bf16 %v160_v9, %v158_v8  ;;  %v162_v13 = vld [vmem:[#allocation2 + $0x28] sm:$0xff]  ;;  %v311_v16 = vpack.c.bf16 %v159_v12, %v157_v10  ;;  %v161_v18 = vld [vmem:[#allocation2 + $0x20] sm:$0xff]  ;;  %v163_v19 = vld [vmem:[#allocation2 + $0x30] sm:$0xff]  ;;  %v169_v40 = vsub.s32 0, %v168_v39  ;;  %v173_v41 = vsub.s32 1, %v168_v39 }
  0x18   :  { %306 = vmatprep.subr.bf16.mxu0 %v305_v6  ;;  %v313_v17 = vpack.c.bf16 %v164_v14, %v162_v13  ;;  %v315_v20 = vpack.c.bf16 %v163_v19, %v161_v18  ;;  %v279_v21 = vld [vmem:[%s492_s2] ss:$0 sm:$0xff] }
  0x19   :  { %310 = vmatprep.subr.bf16.mxu1 %v309_v11  ;;  %v165_v42 = vld [vmem:[%s494_s4] sm:$0x3]  ;;  %s352_s4 = scalar_lea.vmem %s266_s24, 512 }
  0x1a   :  { %312 = vmatpush1.bf16.msra.mxu1 %v311_v16  ;;  %v170_v43 = vrot.slane %v165_v42, %v169_v40  ;;  %v174_v45 = vrot.slane %v165_v42, %v173_v41  ;;  %p353_p8 = scmp.ne.s32.totalorder %s266_s24, %s352_s4  ;;  %p358_p10 = scmp.lt.s32.totalorder %s352_s4, %s352_s4 }
  0x1b   :  { %308 = vmatpush3.bf16.msra.mxu0 %v305_v6  ;;  %314 = vmatprep.subr.bf16.mxu1 %v313_v17 }
  0x1c   :  { %p359_p11 = por %p358_p10, %p357_p9 }
  0x1e   :  { %299 = vmatmul.mubr.msk.f32.vlgmr.msra.gmra.mrb[0].mxu0 %vm50_vm0, %v38_v7  ;;  %316 = vmatpush1.bf16.msra.mxu1 %v315_v20  ;;  %p360_p12 = pnand %p359_p11, %p353_p8 }
  0x21   :  { %282 = vmatmul.mubr.msk.f32.vlgmr.msra.gmra.mrb[0].mxu1 %vm50_vm0, %v37_v5 }
  0x22   :  { %247 = vmatprep.mubr.f32.mxu1 %v381_v15 }
  0x25   :  { %283 = vmatmul.mubr.msk.f32.gmra.mrb[2].mxu1 %vm50_vm0, %v38_v7 }
  0xf1   :  { %v300_v22 = vpop.f32.mrb[0].mxu0 }
  0xf2   :  { %v123_v23 = vpop.f32.mrb[1].mxu0  ;;  %v129_v25 = vadd.f32 %v300_v22, %v279_v21 }
  0xf3   :  { %v124_v24 = vadd.f32 %v279_v21, %v123_v23 }
  0xf4   :  { %v136_v27 = vsel %vm132_vm1, %v129_v25, -inf  ;;  %v243_v44 = vpop.f32.mrb[0].mxu1 }
  0xf5   :  { %v133_v26 = vsel %vm132_vm1, %v124_v24, -inf  ;;  %v245_v46 = vpop.f32.mrb[1].mxu1  ;;  %v244_v47 = vadd.f32 %v243_v44, %v170_v43 }
  0xf6   :  { %134 = vmax.xlane.f32.xlu0 %v133_v26  ;;  %v246_v48 = vadd.f32 %v245_v46, %v174_v45 }
  0xf7   :  { %254 = vst [vmem:[#allocation5] sm:$0xff] %v244_v47 }
  0xf8   :  { %255 = vst.msk [vmem:[#allocation5 + $0x8] sm:$0xff] %vm50_vm0, %v246_v48  ;;  %v249_v49 = vpop.f32.mrb[2].mxu1 }
  0xf9   :  { %v251_v50 = vpop.f32.mrb[3].mxu1  ;;  %v250_v51 = vadd.f32 %v249_v49, %v170_v43 }
  0xfa   :  { %137 = vmax.xlane.f32.xlu0 %v136_v27  ;;  %v252_v52 = vadd.f32 %v251_v50, %v174_v45 }
  0xfb   :  { %256 = vst [vmem:[#allocation5 + $0x10] sm:$0xff] %v250_v51 }
  0xfc   :  { %257 = vst.msk [vmem:[#allocation5 + $0x18] sm:$0xff] %vm50_vm0, %v252_v52 }
 0x183   :  { %v135_v28 = vpop.xlane.xlu0 %134 }
 0x184   :  { %v139_v29 = vsub.f32 %v124_v24, %v135_v28 }
 0x186   :  { %v141_v30 = vmul.f32 1.442695, %v139_v29 }
 0x187   :  { %v138_v31 = vpop.xlane.xlu0 %137 }
 0x188   :  { %322 = vpow2.f32 %v141_v30  ;;  %v140_v32 = vsub.f32 %v129_v25, %v138_v31 }
 0x18a   :  { %v143_v33 = vmul.f32 1.442695, %v140_v32 }
 0x18c   :  { %324 = vpow2.f32 %v143_v33 }
 0x192   :  { %v323_v34 = vpop.eup %322 }
 0x193   :  { %v145_v35 = vsel %vm132_vm1, %v323_v34, 0.0 }
 0x194   :  { %146 = vadd.xlane.f32.xlu1 %v145_v35 }
 0x196   :  { %v325_v36 = vpop.eup %324 }
 0x197   :  { %v148_v37 = vsel %vm132_vm1, %v325_v36, 0.0 }
 0x198   :  { %149 = vadd.xlane.f32.xlu1 %v148_v37 }
 0x199   :  { %363 = shalt.err (!%p360_p12)
}
 0x19a   :  { %s364_s27 = scalar_lea.hbm %s496_s6, 512 }
 0x19b   :  { %p365_p13 = scmp.ne.s32.totalorder %s496_s6, %s364_s27  ;;  %p368_p0 = scmp.lt.u32.totalorder %s364_s27, %s496_s6 }
 0x19d   :  { %p370_p1 = pnand %p368_p0, %p365_p13 }
 0x19f   :  { %373 = shalt.err (!%p370_p1)
}
 0x1a0   :  { %271 = dma.vmem_to_hbm [thread:$0]  %s266_s24, 512, %s496_s6, [#allocation4], %s379_s7, %s379_s7, %s380_s8  }
 0x221   :  { %v147_v53 = vpop.xlane.xlu1 %146 }
 0x222   :  { %326 = vrcp.f32 %v147_v53 }
 0x225   :  { %v150_v54 = vpop.xlane.xlu1 %149 }
 0x226   :  { %328 = vrcp.f32 %v150_v54 }
 0x22c   :  { %v327_v55 = vpop.eup %326 }
 0x22d   :  { %v152_v56 = vmul.f32 %v327_v55, %v323_v34 }
 0x22f   :  { %155 = vst.msk [vmem:[%s495_s5] sm:$0xff] %vm132_vm1, %v152_v56 }
 0x230   :  { %v329_v57 = vpop.eup %328 }
 0x231   :  { %v154_v58 = vmul.f32 %v329_v57, %v325_v36 }
 0x233   :  { %156 = vst.msk [vmem:[%s495_s5 + $0x8] sm:$0xff] %vm132_vm1, %v154_v58 }
 0x234   :  { %376 = dma.done.wait [#allocation4], 512  }
 0x235   :  { %377 = vsyncadd [#allocation4], 4294966784 }
 0x236   :  { %277 = vsyncpa [#allocation3], 1 }
 0x237   :  { %278 = vsyncpa [#allocation4], 1 }

</bundles_post_ra>
